<compile_context>
chip_gen: v7x
topology: tpu7x:2x2x1
jax: 0.10.0
libtpu: 0.0.40
codegen_flags: <defaults>
</compile_context>

<pallas_src>
import functools

import jax
import jax.numpy as jnp
from jax.experimental import pallas as pl
from jax.experimental.pallas import tpu as pltpu

_MiB = 1024 * 1024
_LANE = 128
_SUBLANE = 8


def _vmem_caps():
    """Generation-aware (block_budget_bytes, vmem_limit_cap_bytes)."""
    cap = 64 * _MiB  # conservative default == v7x per-core VMEM; safe on every generation
    try:
        cap = int(pltpu.get_tpu_info().vmem_capacity_bytes)
    except Exception:  # query unavailable -> keep the conservative default
        pass
    limit_cap = max(32 * _MiB, cap - 12 * _MiB)                      # headroom for Mosaic scratch
    budget = max(16 * _MiB, min(int(0.75 * cap), limit_cap - 6 * _MiB))
    return budget, limit_cap


def _se_fc(mean_f32, w_sq_ref, b_sq_ref, w_ex_ref, b_ex_ref):
    """squeeze -> relu -> expand -> sigmoid on a per-sample (C, 1) f32 channel mean."""
    z = jnp.dot(w_sq_ref[...], mean_f32, preferred_element_type=jnp.float32) + b_sq_ref[...]
    z = jnp.maximum(z, 0.0)
    g = jnp.dot(w_ex_ref[...], z, preferred_element_type=jnp.float32) + b_ex_ref[...]
    return jax.nn.sigmoid(g)  # (C, 1) f32


def _se_single_pass_kernel(x_ref, w_sq_ref, b_sq_ref, w_ex_ref, b_ex_ref, o_ref, *, s_total):
    # Block: (1, C, S) in the I/O dtype.  Bind the block ONCE; reduce in f32; apply the gate
    # natively in the I/O dtype (bf16 stays packed -> no full-block f32 convert round-trip).
    xb = x_ref[0]                                                        # (C, S), I/O dtype
    mean = jnp.sum(xb.astype(jnp.float32), axis=-1, keepdims=True) * (1.0 / s_total)
    g = _se_fc(mean, w_sq_ref, b_sq_ref, w_ex_ref, b_ex_ref)            # (C, 1) f32
    o_ref[0] = xb * g.astype(xb.dtype)                                  # broadcast over S


def _se_gate_kernel(x_ref, w_sq_ref, b_sq_ref, w_ex_ref, b_ex_ref, g_ref, acc_ref,
                    *, s_total, ts):
    # Two-pass fallback, pass 1: accumulate the per-channel spatial sum over S tiles; emit the
    # gate (already cast to the I/O dtype) on the last tile.
    s = pl.program_id(1)

    @pl.when(s == 0)
    def _():
        acc_ref[...] = jnp.zeros_like(acc_ref)

    x = x_ref[0].astype(jnp.float32)                                    # (C, ts)
    if s_total % ts != 0:  # static branch: mask the ragged last tile
        lane = jax.lax.broadcasted_iota(jnp.int32, x.shape, 1)
        x = jnp.where(s * ts + lane < s_total, x, 0.0)
    acc_ref[...] += jnp.sum(x, axis=-1, keepdims=True)

    @pl.when(s == pl.num_programs(1) - 1)
    def _():
        mean = acc_ref[...] * (1.0 / s_total)
        g_ref[0] = _se_fc(mean, w_sq_ref, b_sq_ref, w_ex_ref, b_ex_ref).astype(g_ref.dtype)


def _se_apply_kernel(x_ref, g_ref, o_ref):
    # Two-pass fallback, pass 2: pure native-dtype elementwise gate apply, fully parallel tiles.
    # Ragged-tile padding lanes/rows are computed on garbage but their stores are clipped.
    o_ref[0] = x_ref[0] * g_ref[0]


def se_module(x, w_sq, b_sq, w_ex, b_ex, *, vmem_block_budget_bytes=None):
    """x: (N, C, D, H, W); w_sq: (Cs, C, 1, 1, 1); b_sq: (Cs,); w_ex: (C, Cs, 1, 1, 1);
    b_ex: (C,). Returns x * SE-gate(x), same shape and dtype as x."""
    N, C, D, H, W = x.shape
    S = D * H * W
    Cs = w_sq.shape[0]
    dt = x.dtype
    itemsize = jnp.dtype(dt).itemsize

    budget, vmem_limit_cap = _vmem_caps()
    if vmem_block_budget_bytes is not None:           # explicit override (used by tests)
        budget = int(vmem_block_budget_bytes)

    def call_limit(needed_bytes):
        return int(min(vmem_limit_cap, max(32 * _MiB, needed_bytes + 16 * _MiB)))

    x3 = x.reshape(N, C, S)                           # keep the input dtype (bf16 stays bf16)
    w_sq2 = w_sq.reshape(Cs, C).astype(jnp.float32)
    b_sq2 = b_sq.reshape(Cs, 1).astype(jnp.float32)
    w_ex2 = w_ex.reshape(C, Cs).astype(jnp.float32)
    b_ex2 = b_ex.reshape(C, 1).astype(jnp.float32)
    w_bytes = 4 * (Cs * C + Cs + C * Cs + C)

    block_bytes = C * S * itemsize
    flops = 2 * N * C * S + 4 * N * C * Cs

    w_specs = [
        pl.BlockSpec((Cs, C), lambda *a: (0, 0)),
        pl.BlockSpec((Cs, 1), lambda *a: (0, 0)),
        pl.BlockSpec((C, Cs), lambda *a: (0, 0)),
        pl.BlockSpec((C, 1), lambda *a: (0, 0)),
    ]

    def single_pass(single_buffer):
        # With one grid step per core (N == 1) double-buffering buys nothing; pl.Buffered(1)
        # halves block VMEM so ~2x larger C*S stays on this traffic-optimal path.
        spec_kwargs = {"pipeline_mode": pl.Buffered(1)} if single_buffer else {}
        x_spec = pl.BlockSpec((1, C, S), lambda n: (n, 0, 0), **spec_kwargs)
        o_spec = pl.BlockSpec((1, C, S), lambda n: (n, 0, 0), **spec_kwargs)
        needed = (2 if single_buffer else 4) * block_bytes + 2 * w_bytes
        out = pl.pallas_call(
            functools.partial(_se_single_pass_kernel, s_total=S),
            out_shape=jax.ShapeDtypeStruct((N, C, S), dt),
            grid=(N,),
            in_specs=[x_spec] + w_specs,
            out_specs=o_spec,
            input_output_aliases={0: 0},
            compiler_params=pltpu.CompilerParams(
                dimension_semantics=("parallel",), vmem_limit_bytes=call_limit(needed)),
            cost_estimate=pl.CostEstimate(
                flops=flops, transcendentals=N * C,
                bytes_accessed=2 * N * C * S * itemsize + w_bytes),
        )(x3, w_sq2, b_sq2, w_ex2, b_ex2)
        return out.reshape(N, C, D, H, W)

    def two_pass():
        s_pad = pl.cdiv(S, _LANE) * _LANE

        # --- pass 1: per-sample channel mean (accumulated over "arbitrary" S) -> gate (N,C,1) ---
        max_ts1 = max(_LANE, (budget // max(1, 4 * C * itemsize)) // _LANE * _LANE)
        ts1 = min(max_ts1, s_pad)
        if ts1 >= S:
            ts1 = S                                    # single full-extent spatial tile
        n_s1 = pl.cdiv(S, ts1)
        needed1 = 4 * C * ts1 * itemsize + 2 * w_bytes + 4 * C
        gate = pl.pallas_call(
            functools.partial(_se_gate_kernel, s_total=S, ts=ts1),
            out_shape=jax.ShapeDtypeStruct((N, C, 1), dt),
            grid=(N, n_s1),
            in_specs=[pl.BlockSpec((1, C, ts1), lambda n, s: (n, 0, s))] + w_specs,
            out_specs=pl.BlockSpec((1, C, 1), lambda n, s: (n, 0, 0)),
            scratch_shapes=[pltpu.VMEM((C, 1), jnp.float32)],
            compiler_params=pltpu.CompilerParams(
                dimension_semantics=("parallel", "arbitrary"),
                vmem_limit_bytes=call_limit(needed1)),
            cost_estimate=pl.CostEstimate(
                flops=N * C * S + 4 * N * C * Cs, transcendentals=N * C,
                bytes_accessed=N * C * S * itemsize + w_bytes + N * C * itemsize),
        )(x3, w_sq2, b_sq2, w_ex2, b_ex2)

        # --- pass 2: elementwise gate apply; lane-dense tiles, C tiled when it is very large ---
        per_block = max(1, budget // 4)                # x in + out, double-buffered
        tc = C
        ts2 = (per_block // max(1, tc * itemsize)) // _LANE * _LANE
        want_ts = min(512, s_pad)                      # >=512 lanes ~= 85% of HBM roofline
        if ts2 < want_ts and C > _SUBLANE:
            tc = min(C, max(_SUBLANE,
                            (per_block // max(1, want_ts * itemsize)) // _SUBLANE * _SUBLANE))
            ts2 = (per_block // max(1, tc * itemsize)) // _LANE * _LANE
        ts2 = max(_LANE, min(ts2, s_pad)) if S >= _LANE else S
        if ts2 >= S:
            ts2 = S
        n_c = pl.cdiv(C, tc)
        n_s2 = pl.cdiv(S, ts2)
        needed2 = 4 * tc * ts2 * itemsize + 4 * tc * itemsize
        out = pl.pallas_call(
            _se_apply_kernel,
            out_shape=jax.ShapeDtypeStruct((N, C, S), dt),
            grid=(N, n_c, n_s2),
            in_specs=[
                pl.BlockSpec((1, tc, ts2), lambda n, c, s: (n, c, s)),
                pl.BlockSpec((1, tc, 1), lambda n, c, s: (n, c, 0)),
            ],
            out_specs=pl.BlockSpec((1, tc, ts2), lambda n, c, s: (n, c, s)),
            input_output_aliases={0: 0},
            compiler_params=pltpu.CompilerParams(
                dimension_semantics=("parallel", "parallel", "parallel"),
                vmem_limit_bytes=call_limit(needed2)),
            cost_estimate=pl.CostEstimate(
                flops=N * C * S, transcendentals=0,
                bytes_accessed=2 * N * C * S * itemsize + N * C * itemsize),
        )(x3, gate)
        return out.reshape(N, C, D, H, W)

    single_buffer = (N == 1)                           # one grid step -> single-buffer the block
    needed = (2 if single_buffer else 4) * block_bytes + 2 * w_bytes
    if needed <= budget or S < _LANE:
        if single_buffer:
            try:
                return single_pass(True)
            except Exception:
                # pipeline_mode / pl.Buffered(1) unsupported or rejected on this jax version:
                # retry the conservative double-buffered single pass if it fits, else two-pass.
                if 4 * block_bytes + 2 * w_bytes <= budget or S < _LANE:
                    return single_pass(False)
        else:
            return single_pass(False)
    return two_pass()


def se_module_ref(x, w_sq, b_sq, w_ex, b_ex):
    """Pure-JAX reference mirroring the PyTorch forward (computed in f32)."""
    Cs = w_sq.shape[0]
    C = w_ex.shape[0]
    xf = x.astype(jnp.float32)
    mean = jnp.mean(xf, axis=(2, 3, 4))                                  # (N, C)
    z = jnp.maximum(mean @ w_sq.reshape(Cs, C).T + b_sq, 0.0)            # (N, Cs)
    g = jax.nn.sigmoid(z @ w_ex.reshape(C, Cs).T + b_ex)                 # (N, C)
    return xf * g[:, :, None, None, None]


if __name__ == "__main__":
    # Small but SE-realistic shapes: N=2, C=64, reduction=8 -> Cs=8, spatial 4x8x10 (S=320,
    # deliberately NOT a multiple of 128 so ragged-tile handling is exercised).
    N, C, D, H, W = 2, 64, 4, 8, 10
    reduction = 8
    Cs = C // reduction

    key = jax.random.PRNGKey(0)
    kx, k1, k2, k3, k4 = jax.random.split(key, 5)

    x = jax.random.normal(kx, (N, C, D, H, W), dtype=jnp.float32)
    w_sq = jax.random.normal(k1, (Cs, C, 1, 1, 1), dtype=jnp.float32) * jnp.sqrt(2.0 / C)
    w_ex = jax.random.normal(k2, (C, Cs, 1, 1, 1), dtype=jnp.float32) * (1.0 / jnp.sqrt(Cs))
    b_sq = jax.random.uniform(k3, (Cs,), dtype=jnp.float32,
                              minval=-1.0 / jnp.sqrt(C), maxval=1.0 / jnp.sqrt(C))
    b_ex = jax.random.uniform(k4, (C,), dtype=jnp.float32,
                              minval=-1.0 / jnp.sqrt(Cs), maxval=1.0 / jnp.sqrt(Cs))

    ref = se_module_ref(x, w_sq, b_sq, w_ex, b_ex)

    # 1) Auto path (single traffic-optimal pass at these shapes), f32 I/O.
    out = jax.block_until_ready(se_module(x, w_sq, b_sq, w_ex, b_ex))
    assert out.shape == x.shape and out.dtype == x.dtype
    assert jnp.allclose(out, ref, rtol=5e-3, atol=5e-3), "single-pass f32 mismatch"

    # 2) bf16 I/O (HBM traffic halves; sum in f32, gate apply natively in bf16).
    xb = x.astype(jnp.bfloat16)
    out_b = jax.block_until_ready(se_module(xb, w_sq, b_sq, w_ex, b_ex))
    ref_b = se_module_ref(xb.astype(jnp.float32), w_sq, b_sq, w_ex, b_ex)
    assert out_b.dtype == jnp.bfloat16
    assert jnp.allclose(out_b.astype(jnp.float32), ref_b, rtol=5e-2, atol=5e-2), "bf16 mismatch"

    # 3) Force the two-pass spatially-tiled fallback (what a too-large C*S picks) and check it,
    #    including the ragged last S tile and the C-tiled apply pass.
    out2 = jax.block_until_ready(
        se_module(x, w_sq, b_sq, w_ex, b_ex, vmem_block_budget_bytes=1))
    assert jnp.allclose(out2, ref, rtol=5e-3, atol=5e-3), "two-pass fallback mismatch"

    # 4) N == 1 exercises the single-buffered (pl.Buffered(1)) single-pass path.
    out1 = jax.block_until_ready(se_module(x[:1], w_sq, b_sq, w_ex, b_ex))
    assert jnp.allclose(out1, ref[:1], rtol=5e-3, atol=5e-3), "N==1 single-buffer mismatch"

    print("KERNEL_OK")
</pallas_src>

<mosaic_0001>
module attributes {stable_mosaic.version = 11 : i64} {
  func.func @_se_single_pass_kernel(%arg0: i32, %arg1: memref<1x64x320xf32, #tpu.memory_space<vmem>>, %arg2: memref<8x64xf32, #tpu.memory_space<vmem>>, %arg3: memref<8x1xf32, #tpu.memory_space<vmem>>, %arg4: memref<64x8xf32, #tpu.memory_space<vmem>>, %arg5: memref<64x1xf32, #tpu.memory_space<vmem>>, %arg6: memref<1x64x320xf32, #tpu.memory_space<vmem>>) attributes {dimension_semantics = [#tpu.dimension_semantics<parallel>], iteration_bounds = array<i64: 2>, scalar_prefetch = 0 : i64, scratch_operands = 0 : i64, tpu.core_type = #tpu.core_type<tc>, window_params = [{transform_indices = @transform_0, window_bounds = array<i64: 1, 64, 320>}, {pipeline_mode = #tpu.pipeline_mode<synchronous>, transform_indices = @transform_1, window_bounds = array<i64: 8, 64>}, {pipeline_mode = #tpu.pipeline_mode<synchronous>, transform_indices = @transform_2, window_bounds = array<i64: 8, 1>}, {pipeline_mode = #tpu.pipeline_mode<synchronous>, transform_indices = @transform_3, window_bounds = array<i64: 64, 8>}, {pipeline_mode = #tpu.pipeline_mode<synchronous>, transform_indices = @transform_4, window_bounds = array<i64: 64, 1>}, {transform_indices = @transform_5, window_bounds = array<i64: 1, 64, 320>}]} {
    %c0 = arith.constant 0 : index
    %c0_0 = arith.constant 0 : index
    %c0_1 = arith.constant 0 : index
    %0 = vector.load %arg1[%c0, %c0_0, %c0_1] : memref<1x64x320xf32, #tpu.memory_space<vmem>>, vector<1x64x320xf32>
    %1 = vector.shape_cast %0 : vector<1x64x320xf32> to vector<64x320xf32>
    %cst = arith.constant dense<0.000000e+00> : vector<64xf32>
    %2 = vector.multi_reduction <add>, %1, %cst [1] : vector<64x320xf32> to vector<64xf32>
    %3 = vector.shape_cast %2 : vector<64xf32> to vector<64x1xf32>
    %cst_2 = arith.constant 3.125000e-03 : f32
    %4 = vector.broadcast %cst_2 : f32 to vector<64x1xf32>
    %5 = arith.mulf %3, %4 : vector<64x1xf32>
    %c0_3 = arith.constant 0 : index
    %c0_4 = arith.constant 0 : index
    %6 = vector.load %arg2[%c0_3, %c0_4] : memref<8x64xf32, #tpu.memory_space<vmem>>, vector<8x64xf32>
    %cst_5 = arith.constant dense<0.000000e+00> : vector<8x1xf32>
    %7 = tpu.matmul %6, %5, %cst_5 {dimension_numbers = #tpu.dot_dimension_numbers<[1], [0], [0], [1], [0, 0, 1, 1], [], []>} : vector<8x64xf32>, vector<64x1xf32>, vector<8x1xf32> -> vector<8x1xf32>
    %c0_6 = arith.constant 0 : index
    %c0_7 = arith.constant 0 : index
    %8 = vector.load %arg3[%c0_6, %c0_7] : memref<8x1xf32, #tpu.memory_space<vmem>>, vector<8x1xf32>
    %9 = arith.addf %7, %8 : vector<8x1xf32>
    %cst_8 = arith.constant 0.000000e+00 : f32
    %10 = vector.broadcast %cst_8 : f32 to vector<8x1xf32>
    %11 = arith.maximumf %9, %10 : vector<8x1xf32>
    %c0_9 = arith.constant 0 : index
    %c0_10 = arith.constant 0 : index
    %12 = vector.load %arg4[%c0_9, %c0_10] : memref<64x8xf32, #tpu.memory_space<vmem>>, vector<64x8xf32>
    %cst_11 = arith.constant dense<0.000000e+00> : vector<64x1xf32>
    %13 = tpu.matmul %12, %11, %cst_11 {dimension_numbers = #tpu.dot_dimension_numbers<[1], [0], [0], [1], [0, 0, 1, 1], [], []>} : vector<64x8xf32>, vector<8x1xf32>, vector<64x1xf32> -> vector<64x1xf32>
    %c0_12 = arith.constant 0 : index
    %c0_13 = arith.constant 0 : index
    %14 = vector.load %arg5[%c0_12, %c0_13] : memref<64x1xf32, #tpu.memory_space<vmem>>, vector<64x1xf32>
    %15 = arith.addf %13, %14 : vector<64x1xf32>
    %16 = arith.negf %15 : vector<64x1xf32>
    %17 = math.exp %16 : vector<64x1xf32>
    %cst_14 = arith.constant 1.000000e+00 : f32
    %18 = vector.broadcast %cst_14 : f32 to vector<64x1xf32>
    %19 = arith.addf %18, %17 : vector<64x1xf32>
    %20 = arith.divf %18, %19 : vector<64x1xf32>
    %21 = vector.broadcast %20 : vector<64x1xf32> to vector<64x320xf32>
    %22 = arith.mulf %1, %21 : vector<64x320xf32>
    %c0_15 = arith.constant 0 : index
    %c0_16 = arith.constant 0 : index
    %c0_17 = arith.constant 0 : index
    %23 = vector.load %arg6[%c0_15, %c0_16, %c0_17] : memref<1x64x320xf32, #tpu.memory_space<vmem>>, vector<1x64x320xf32>
    %24 = vector.shape_cast %23 : vector<1x64x320xf32> to vector<64x320xf32>
    %25 = vector.shape_cast %22 : vector<64x320xf32> to vector<1x64x320xf32>
    tpu.vector_store %arg6[%c0_15, %c0_16, %c0_17], %25 {strides = array<i32>} : memref<1x64x320xf32, #tpu.memory_space<vmem>>, vector<1x64x320xf32>,
    return
  }
  func.func @transform_0(%arg0: i32) -> (i32, i32, i32) {
    %c0_i32 = arith.constant 0 : i32
    %c0_i32_0 = arith.constant 0 : i32
    %c0_i32_1 = arith.constant 0 : i32
    return %arg0, %c0_i32, %c0_i32_0 : i32, i32, i32
  }
  func.func @transform_1(%arg0: i32) -> (i32, i32) {
    %c0_i32 = arith.constant 0 : i32
    %c0_i32_0 = arith.constant 0 : i32
    %c0_i32_1 = arith.constant 0 : i32
    return %c0_i32, %c0_i32_0 : i32, i32
  }
  func.func @transform_2(%arg0: i32) -> (i32, i32) {
    %c0_i32 = arith.constant 0 : i32
    %c0_i32_0 = arith.constant 0 : i32
    %c0_i32_1 = arith.constant 0 : i32
    return %c0_i32, %c0_i32_0 : i32, i32
  }
  func.func @transform_3(%arg0: i32) -> (i32, i32) {
    %c0_i32 = arith.constant 0 : i32
    %c0_i32_0 = arith.constant 0 : i32
    %c0_i32_1 = arith.constant 0 : i32
    return %c0_i32, %c0_i32_0 : i32, i32
  }
  func.func @transform_4(%arg0: i32) -> (i32, i32) {
    %c0_i32 = arith.constant 0 : i32
    %c0_i32_0 = arith.constant 0 : i32
    %c0_i32_1 = arith.constant 0 : i32
    return %c0_i32, %c0_i32_0 : i32, i32
  }
  func.func @transform_5(%arg0: i32) -> (i32, i32, i32) {
    %c0_i32 = arith.constant 0 : i32
    %c0_i32_0 = arith.constant 0 : i32
    %c0_i32_1 = arith.constant 0 : i32
    return %arg0, %c0_i32, %c0_i32_0 : i32, i32, i32
  }
}

</mosaic_0001>

<bundles_post_ra>
// kernel: tpu_custom_call.1
= control target key start
LH: loop header
LB: loop body
LE: loop exit
PB: predicated region body
PF: predicated region fallthrough
CT: control target
= control target key end

     0   :  { %10 = vsyncpa [#allocation3], 0  ;;  %s1467_s0 = inlined_call_operand.hbm [shape: f32[2,64,320], index: 0, kind: input, shape index: {}, may-alias: {0,5}]   ;;  %s1468_s1 = inlined_call_operand.vmem [shape: f32[8,64], index: 1, kind: input, shape index: {}]   ;;  %s1469_s2 = inlined_call_operand.vmem [shape: f32[8,1], index: 2, kind: input, shape index: {}]   ;;  %s1470_s3 = inlined_call_operand.vmem [shape: f32[64,8], index: 3, kind: input, shape index: {}]   ;;  %s1471_s4 = inlined_call_operand.vmem [shape: f32[64,1], index: 4, kind: input, shape index: {}]   ;;  %s1472_s5 = inlined_call_operand.hbm [shape: f32[2,64,320], index: 5, kind: output, shape index: {}, may-alias: {0,5}]  }
   0x1   :  { %12 = vsyncpa [#allocation3 + $0x1], 0 }
   0x2   :  { %13 = vsyncpa [#allocation4], 0 }
   0x3   :  { %15 = vsyncpa [#allocation4 + $0x1], 0  ;;  %s1079_s18 = smov 0   ;;  %s1081_s19 = smov 0  }
   0x4   :  { %s1083_s20 = smov 0   ;;  %s1085_s21 = smov 0  }
   0x5 LB: > { %s1100_s22 = sadd.s32 4294967295, %s1037_s21   ;;  %s761_s23 = sadd.s32 4294967294, %s1037_s21   ;;  %s1037_s21 = sphi %s1085_s21, %s1484_s21   ;;  %s1033_s20 = sphi %s1083_s20, %s1483_s20   ;;  %s1029_s19 = sphi %s1081_s19, %s1482_s19   ;;  %s1025_s18 = sphi %s1079_s18, %s1481_s18  }
   0x6   : > { %s1104_s24 = sadd.s32 1, %s1037_s21   ;;  %s28_s25 = sadd.s32 1, %s1033_s20 }
   0x7   : > { %s25_s26 = ssub.s32 %s1037_s21, %s1104_s24  ;;  %p35_p0 = scmp.ne.s32.totalorder %s1033_s20, %s1029_s19 }
   0x8   : > { %p26_p1 = scmp.eq.s32.totalorder %s25_s26, 0  ;;  %p36_p2 = scmp.eq.s32.totalorder %s1037_s21, 0 }
   0x9   : > { %p41_p3 = scmp.ne.s32.totalorder %s1029_s19, %s1025_s18  ;;  %p42_p4 = scmp.eq.s32.totalorder %s1100_s22, 0 }
   0xa   : > { %s1116_s27 = scalar_select %p26_p1, %s1033_s20, %s28_s25  }
   0xb   : > { %p37_p5 = por %p36_p2, %p35_p0  ;;  %p1118_p6 = por %p42_p4, %p41_p3 }
   0xc   : > { %p149_p7 = scmp.eq.s32.totalorder %s1100_s22, 1  ;;  %p155_p8 = scmp.eq.s32.totalorder %s761_s23, 1 }
   0xd   : > { %p865_p10 = scmp.lt.s32.totalorder %s1037_s21, 2  ;;  %s187_s6 = sand.u32 1, %s1033_s20  }
   0xe   : > { %p1125_p11 = por %p149_p7, %p35_p0  ;;  %p1129_p12 = por %p155_p8, %p41_p3 }
   0xf   : > { %s850_s7 = smul.u32 3072, %s1037_s21  ;;  %p1140_p13 = pnand %p865_p10, %p37_p5 }
  0x10   : > { %s1475_s29 = scalar_select %p1125_p11, 1, 0 }
  0x11   : > { %s1476_s30 = scalar_select %p1129_p12, 1, 0 }
  0x12   : > { %s849_s8 = smul.u32 192, %s187_s6  ;;  %s1138_s11 = scalar_lea.hbm %s1467_s0, %s850_s7 }
  0x13   : > { %s1146_s15 = scalar_lea.sflag [#allocation3], %s187_s6  ;;  %s941_s16 = scalar_lea.hbm %s1138_s11, 3072 }
  0x14   : > { %s191_s13 = scalar_lea.vmem [#allocation2], %s849_s8  ;;  %p942_p0 = scmp.ne.s32.totalorder %s1138_s11, %s941_s16 }
  0x15   : > { %s198_s14 = sshll.u32 %s191_s13, 4  ;;  %p943_p1 = pneg %p1140_p13  ;;  %s1144_s14 = int_to_ptr.vmem [resolvable:$true] %s198_s14 }
  0x16   : > { %s946_s25 = scalar_lea.hbm %s1467_s0, 6144  ;;  %p947_p4 = scmp.lt.u32.totalorder %s1138_s11, %s1467_s0 }
  0x17   : > { %p944_p2 = pnand %p943_p1, %p942_p0  ;;  %p948_p5 = scmp.lt.u32.totalorder %s946_s25, %s941_s16 }
  0x18   : > { %p950_p8 = scmp.lt.u32.totalorder %s941_s16, %s1138_s11 }
  0x19   : > { %p945_p3 = pneg %p944_p2  ;;  %p949_p7 = por %p948_p5, %p947_p4 }
  0x1b   : > { %p951_p10 = por %p950_p8, %p949_p7 }
  0x1d   : > { %p952_p9 = pnand %p951_p10, %p945_p3 }
  0x1f   : > { %955 = shalt.err (!%p952_p9)
}
  0x20   : > { %s956_s6 = scalar_lea.vmem %s1144_s14, 3072  ;;  %s1039_s8 = smov [#allocation2]  }
  0x21   : > { %p957_p0 = scmp.ne.s32.totalorder %s1144_s14, %s956_s6  ;;  %s961_s9 = sshll.u32 %s1039_s8, 4  ;;  %s962_s9 = int_to_ptr.vmem [resolvable:$false] %s961_s9 }
  0x22   : > { %s963_s10 = scalar_lea.vmem %s962_s9, 6144  ;;  %p964_p11 = scmp.lt.s32.totalorder %s1144_s14, %s962_s9 }
  0x23   : > { %p959_p2 = pnand %p957_p0, %p943_p1  ;;  %p965_p4 = scmp.lt.s32.totalorder %s963_s10, %s956_s6 }
  0x25   : > { %p960_p12 = pneg %p959_p2  ;;  %p966_p5 = por %p965_p4, %p964_p11 }
  0x27   : > { %p967_p7 = pnand %p966_p5, %p960_p12 }
  0x29   : > { %970 = shalt.err (!%p967_p7)
}
  0x2a   : > { %s1040_s13 = smov 384   ;;  %s1041_s16 = smov 24  }
  0x2b   : > { %860 = dma.hbm_to_vmem [thread:$0]  (!%p1140_p13), %s1138_s11, 3072, %s1144_s14, %s1146_s15, %s1040_s13, %s1040_s13, %s1041_s16  }
  0x2c   : > { %p765_p9 = scmp.ge.s32.totalorder %s1037_s21, 1  ;;  %p206_p1 = scmp.lt.s32.totalorder %s1037_s21, 3 }
  0x2e   : > { %p207_p3 = pnand %p765_p9, %p206_p1 }
  0x2f   : > { %s1177_s17 = sand.u32 (!%p207_p3), 1, %s1029_s19  }
  0x30   : > { %210 = sbr.rel (%p207_p3) target bundleno = 856 (0x358), region = 40  ;;  %s213_s25 = scalar_lea.sflag (!%p207_p3), [#allocation3], %s1177_s17 }
  0x31   : > { %s851_s23 = smul.u32 (!%p207_p3), 192, %s1177_s17 }
  0x33   : > { %s1183_s26 = scalar_lea.vmem (!%p207_p3), [#allocation2], %s851_s23 }
  0x37   : > { %1016 = dma.done.wait (%p1118_p6), %s213_s25, 3072  }
  0x38   : > { %1018 = vsyncadd (%p1118_p6), %s213_s25, 4294964224  ;;  %vm268_vm0 = vcmask 523264   ;;  %v1190_v0 = vld [vmem:[%s1183_s26 + $0x30] sm:$0xff]  ;;  %v1193_v1 = vld [vmem:[%s1183_s26 + $0x38] sm:$0xff]  ;;  %v1042_v48 = vmov 0.0|0.0   ;;  %vm1043_vm1 = vmmov 0  }
  0x39   : > { %v1196_v2 = vld [vmem:[%s1183_s26 + $0x40] sm:$0xff]  ;;  %v278_v3 = vadd.f32 %v1193_v1, %v1190_v0  ;;  %v1206_v6 = vld [vmem:[%s1183_s26 + $0x8] sm:$0xff]  ;;  %v1209_v7 = vld [vmem:[%s1183_s26 + $0x10] sm:$0xff]  ;;  %837 = vmatprep.subr.bf16.mxu0 %v1042_v48  ;;  %v1044_v49 = vmov 0.0   ;;  %vm408_vm2 = vcmask 64512   ;;  %s1364_s9 = scalar_lea.vmem [#allocation5], %s851_s23 }
  0x3a   : > { %v279_v4 = vsel %vm268_vm0, %v1196_v2, 0.0  ;;  %v1203_v5 = vld [vmem:[%s1183_s26] sm:$0xff]  ;;  %v269_v9 = vsel %vm268_vm0, %v1209_v7, 0.0  ;;  %v1216_v10 = vld [vmem:[%s1183_s26 + $0x48] sm:$0xff]  ;;  %v1219_v11 = vld [vmem:[%s1183_s26 + $0x50] sm:$0xff]  ;;  %820 = vmatprep.mubr.msk.f32.mxu0 %vm1043_vm1, %v1044_v49  ;;  %s852_s23 = smul.u32 3072, %s1100_s22 }
  0x3b   : > { %v267_v8 = vadd.f32 %v1206_v6, %v1203_v5  ;;  %v1222_v12 = vld [vmem:[%s1183_s26 + $0x58] sm:$0xff]  ;;  %v280_v13 = vadd.f32 %v279_v4, %v278_v3  ;;  %v283_v14 = vadd.f32 %v1219_v11, %v1216_v10  ;;  %v1232_v17 = vld [vmem:[%s1183_s26 + $0x20] sm:$0xff]  ;;  %v1235_v18 = vld [vmem:[%s1183_s26 + $0x28] sm:$0xff]  ;;  %s688_s10 = sshll.u32 %s1364_s9, 4  ;;  %s675_s22 = scalar_lea.sflag [#allocation4], %s1177_s17  ;;  %s1416_s10 = int_to_ptr.vmem [resolvable:$true] %s688_s10 }
  0x3c   : > { %v284_v15 = vsel %vm268_vm0, %v1222_v12, 0.0  ;;  %v1229_v16 = vld [vmem:[%s1183_s26 + $0x18] sm:$0xff]  ;;  %v274_v21 = vsel %vm268_vm0, %v1235_v18, 0.0  ;;  %v1245_v23 = vld [vmem:[%s1183_s26 + $0x80] sm:$0xff]  ;;  %v1248_v24 = vld [vmem:[%s1183_s26 + $0x88] sm:$0xff]  ;;  %s1414_s25 = scalar_lea.hbm %s1472_s5, %s852_s23  ;;  %p1478_p11 = scmp.ne.s32.totalorder %s1475_s29, 0 }
  0x3d   : > { %v270_v19 = vadd.f32 %v269_v9, %v267_v8  ;;  %v273_v20 = vadd.f32 %v1232_v17, %v1229_v16  ;;  %v1242_v22 = vld [vmem:[%s1183_s26 + $0x78] sm:$0xff]  ;;  %281 = vadd.xlane.f32.xlu1 %v280_v13  ;;  %v285_v25 = vadd.f32 %v284_v15, %v283_v14  ;;  %v1253_v27 = vld [vmem:[%s1183_s26 + $0x60] sm:$0xff]  ;;  %v1256_v28 = vld [vmem:[%s1183_s26 + $0x68] sm:$0xff]  ;;  %v294_v31 = vsel %vm268_vm0, %v1248_v24, 0.0  ;;  %s1046_s28 = smov [#allocation5]  }
  0x3e   : > { %v293_v26 = vadd.f32 %v1245_v23, %v1242_v22  ;;  %v1259_v29 = vld [vmem:[%s1183_s26 + $0x70] sm:$0xff]  ;;  %v288_v32 = vadd.f32 %v1256_v28, %v1253_v27  ;;  %v1266_v33 = vld [vmem:[%s1183_s26 + $0xa8] sm:$0xff]  ;;  %v1274_v36 = vld [vmem:[%s1183_s26 + $0xb8] sm:$0xff]  ;;  %s975_s11 = sshll.u32 %s1046_s28, 4  ;;  %s976_s11 = int_to_ptr.vmem [resolvable:$false] %s975_s11 }
  0x3f   : > { %271 = vadd.xlane.f32.xlu0 %v270_v19  ;;  %v275_v30 = vadd.f32 %v274_v21, %v273_v20  ;;  %v1269_v34 = vld [vmem:[%s1183_s26 + $0xb0] sm:$0xff]  ;;  %v289_v35 = vsel %vm268_vm0, %v1259_v29, 0.0  ;;  %v1280_v38 = vld [vmem:[%s1183_s26 + $0x98] sm:$0xff]  ;;  %v1283_v39 = vld [vmem:[%s1183_s26 + $0xa0] sm:$0xff]  ;;  %v304_v43 = vsel %vm268_vm0, %v1274_v36, 0.0  ;;  %s977_s12 = scalar_lea.vmem %s976_s11, 6144  ;;  %p978_p8 = scmp.lt.s32.totalorder %s1416_s10, %s976_s11 }
  0x40   : > { %v1277_v37 = vld [vmem:[%s1183_s26 + $0x90] sm:$0xff]  ;;  %v295_v40 = vadd.f32 %v294_v31, %v293_v26  ;;  %v303_v41 = vadd.f32 %v1269_v34, %v1266_v33  ;;  %v290_v42 = vadd.f32 %v289_v35, %v288_v32  ;;  %v299_v45 = vsel %vm268_vm0, %v1283_v39, 0.0  ;;  %v316_v15 = vld [vmem:[%s1468_s1] sm:$0xff]  ;;  %v393_v31 = vld [vmem:[%s1470_s3 + $0x8] sm:$0xff]  ;;  %s971_s26 = scalar_lea.vmem %s1416_s10, 3072 }
  0x41   : > { %286 = vadd.xlane.f32.xlu1 %v285_v25  ;;  %v298_v44 = vadd.f32 %v1280_v38, %v1277_v37  ;;  %v392_v19 = vld [vmem:[%s1470_s3] sm:$0xff]  ;;  %v394_v32 = vld [vmem:[%s1470_s3 + $0x10] sm:$0xff]  ;;  %v395_v35 = vld [vmem:[%s1470_s3 + $0x18] sm:$0xff]  ;;  %p972_p6 = scmp.ne.s32.totalorder %s1416_s10, %s971_s26  ;;  %p979_p10 = scmp.lt.s32.totalorder %s977_s12, %s971_s26 }
  0x42   : > { %v305_v46 = vadd.f32 %v304_v43, %v303_v41  ;;  %825 = vmatprep.mubr.msk.f32.mxu1 %vm408_vm2, %v392_v19  ;;  %v317_v20 = vld [vmem:[%s1469_s2] sm:$0xff]  ;;  %v397_v41 = vld [vmem:[%s1470_s3 + $0x28] sm:$0xff]  ;;  %v399_v43 = vld [vmem:[%s1470_s3 + $0x38] sm:$0xff] }
  0x43   : > { %276 = vadd.xlane.f32.xlu0 %v275_v30  ;;  %v300_v47 = vadd.f32 %v299_v45, %v298_v44  ;;  %v1045_v44 = vmov 0   ;;  %v401_v45 = vld [vmem:[%s1471_s4 + $0x8] sm:$0xff]  ;;  %p973_p12 = pnand %p972_p6, %p1478_p11  ;;  %p980_p0 = por %p979_p10, %p978_p8 }
  0x44   : > { %908 = vset.pattern.permute.xlu1 %v1045_v44  ;;  %907 = vset.pattern.permute.xlu0 %v1045_v44 }
  0x45   : > { %296 = vadd.xlane.f32.xlu1 %v295_v40  ;;  %v396_v40 = vld [vmem:[%s1470_s3 + $0x20] sm:$0xff]  ;;  %p974_p13 = pneg %p973_p12 }
  0x47   : > { %291 = vadd.xlane.f32.xlu0 %v290_v42  ;;  %v398_v42 = vld [vmem:[%s1470_s3 + $0x30] sm:$0xff]  ;;  %p981_p2 = pnand %p980_p0, %p974_p13 }
  0x49   : > { %306 = vadd.xlane.f32.xlu1 %v305_v46  ;;  %v400_v46 = vld [vmem:[%s1471_s4] sm:$0xff] }
  0x4b   : > { %301 = vadd.xlane.f32.xlu0 %v300_v47 }
  0xca   : > { %v282_v50 = vpop.xlane.xlu1 %281 }
  0xcb   : > { %v310_v56 = vmul.f32 0.003125, %v282_v50 }
  0xcc   : > { %v272_v51 = vpop.xlane.xlu0 %271 }
  0xcd   : > { %v308_v54 = vmul.f32 0.003125, %v272_v51  ;;  %v403_v51 = vld [vmem:[%s1471_s4 + $0x18] sm:$0xff] }
  0xce   : > { %v287_v52 = vpop.xlane.xlu1 %286 }
  0xcf   : > { %v311_v57 = vmul.f32 0.003125, %v287_v52 }
  0xd0   : > { %v277_v53 = vpop.xlane.xlu0 %276 }
  0xd1   : > { %v309_v55 = vmul.f32 0.003125, %v277_v53  ;;  %v841_v63 = vpack.c.bf16 %v311_v57, %v310_v56  ;;  %v402_v53 = vld [vmem:[%s1471_s4 + $0x10] sm:$0xff] }
  0xd2   : > { %v297_v59 = vpop.xlane.xlu1 %296 }
  0xd3   : > { %v838_v58 = vpack.c.bf16 %v309_v55, %v308_v54  ;;  %v313_v61 = vmul.f32 0.003125, %v297_v59  ;;  %v405_v59 = vld [vmem:[%s1471_s4 + $0x28] sm:$0xff] }
  0xd4   : > { %v292_v60 = vpop.xlane.xlu0 %291 }
  0xd5   : > { %839 = vmatpush3.bf16.msra.mxu0 %v838_v58  ;;  %v312_v62 = vmul.f32 0.003125, %v292_v60 }
  0xd6   : > { %840 = vmatprep.subr.bf16.mxu0 %v1042_v48  ;;  %v307_v3 = vpop.xlane.xlu1 %306 }
  0xd7   : > { %v844_v8 = vpack.c.bf16 %v313_v61, %v312_v62  ;;  %v315_v9 = vmul.f32 0.003125, %v307_v3  ;;  %v404_v61 = vld [vmem:[%s1471_s4 + $0x20] sm:$0xff] }
  0xd8   : > { %v302_v4 = vpop.xlane.xlu0 %301 }
  0xd9   : > { %842 = vmatpush3.bf16.msra.mxu0 %v841_v63  ;;  %v314_v13 = vmul.f32 0.003125, %v302_v4 }
  0xda   : > { %843 = vmatprep.subr.bf16.mxu0 %v1042_v48 }
  0xdb   : > { %v847_v14 = vpack.c.bf16 %v315_v9, %v314_v13  ;;  %v406_v13 = vld [vmem:[%s1471_s4 + $0x30] sm:$0xff] }
  0xdd   : > { %845 = vmatpush3.bf16.msra.mxu0 %v844_v8 }
  0xde   : > { %846 = vmatprep.subr.bf16.mxu0 %v1042_v48 }
  0xe1   : > { %848 = vmatpush3.bf16.msra.mxu0 %v847_v14 }
  0xe4   : > { %821 = vmatmul.mubr.msk.f32.vlgmr.msra.gmra.mrb[0].mxu0 %vm268_vm0, %v316_v15 }
 0x1b7   : > { %v387_v21 = vpop.f32.mrb[0].mxu0 }
 0x1b8   : > { %v388_v25 = vadd.f32 %v387_v21, %v317_v20  ;;  %v822_v26 = vpop.f32.mrb[1].mxu0  ;;  %v407_v20 = vld [vmem:[%s1471_s4 + $0x38] sm:$0xff] }
 0x1ba   : > { %v391_v30 = vmax.f32 %v388_v25, 0.0 }
 0x1bc   : > { %823 = vmatprep.subr.mxu1 %v391_v30 }
 0x1bd   : > { %824 = vmatpush3.msra.mxu1 %v391_v30 }
 0x1be   : > { %826 = vmatmul.mubr.msk.f32.vlgmr.msra.gmra.mrb[0].mxu1 %vm408_vm2, %v393_v31 }
 0x1bf   : > { %828 = vmatprep.mubr.msk.f32.mxu1 %vm408_vm2, %v394_v32 }
 0x1c2   : > { %829 = vmatmul.mubr.msk.f32.gmra.mrb[2].mxu1 %vm408_vm2, %v395_v35 }
 0x1c3   : > { %831 = vmatprep.mubr.msk.f32.mxu1 %vm408_vm2, %v396_v40 }
 0x1c6   : > { %832 = vmatmul.mubr.msk.f32.gmra.mrb[4].mxu1 %vm408_vm2, %v397_v41 }
 0x1c7   : > { %834 = vmatprep.mubr.msk.f32.mxu1 %vm408_vm2, %v398_v42 }
 0x1ca   : > { %835 = vmatmul.mubr.msk.f32.gmra.mrb[6].mxu1 %vm408_vm2, %v399_v43 }
 0x291   : > { %v827_v47 = vpop.f32.mrb[0].mxu1 }
 0x292   : > { %v505_v48 = vadd.f32 %v827_v47, %v401_v45  ;;  %v499_v49 = vpop.f32.mrb[1].mxu1 }
 0x293   : > { %v500_v50 = vadd.f32 %v499_v49, %v400_v46 }
 0x294   : > { %v776_v52 = vmul.f32 -1.442695, %v505_v48 }
 0x295   : > { %v775_v54 = vmul.f32 -1.442695, %v500_v50  ;;  %v830_v55 = vpop.f32.mrb[2].mxu1 }
 0x296   : > { %909 = vpow2.f32 %v776_v52  ;;  %v515_v56 = vadd.f32 %v830_v55, %v403_v51  ;;  %v509_v57 = vpop.f32.mrb[3].mxu1 }
 0x297   : > { %911 = vpow2.f32 %v775_v54  ;;  %v510_v58 = vadd.f32 %v509_v57, %v402_v53 }
 0x298   : > { %v778_v60 = vmul.f32 -1.442695, %v515_v56 }
 0x299   : > { %v777_v62 = vmul.f32 -1.442695, %v510_v58  ;;  %v833_v63 = vpop.f32.mrb[4].mxu1 }
 0x29a   : > { %913 = vpow2.f32 %v778_v60  ;;  %v525_v3 = vadd.f32 %v833_v63, %v405_v59  ;;  %v519_v4 = vpop.f32.mrb[5].mxu1 }
 0x29b   : > { %915 = vpow2.f32 %v777_v62  ;;  %v520_v8 = vadd.f32 %v519_v4, %v404_v61 }
 0x29c   : > { %v780_v9 = vmul.f32 -1.442695, %v525_v3 }
 0x29d   : > { %v836_v14 = vpop.f32.mrb[6].mxu1  ;;  %v779_v15 = vmul.f32 -1.442695, %v520_v8 }
 0x29e   : > { %917 = vpow2.f32 %v780_v9  ;;  %v529_v19 = vpop.f32.mrb[7].mxu1  ;;  %v535_v35 = vadd.f32 %v836_v14, %v407_v20 }
 0x29f   : > { %v530_v21 = vadd.f32 %v529_v19, %v406_v13  ;;  %919 = vpow2.f32 %v779_v15 }
 0x2a0   : > { %v910_v25 = vpop.eup %909  ;;  %v782_v43 = vmul.f32 -1.442695, %v535_v35 }
 0x2a1   : > { %v912_v26 = vpop.eup %911  ;;  %v563_v30 = vadd.f32 1.0, %v910_v25  ;;  %v781_v31 = vmul.f32 -1.442695, %v530_v21 }
 0x2a2   : > { %v562_v32 = vadd.f32 1.0, %v912_v26 }
 0x2a3   : > { %921 = vrcp.f32 %v563_v30 }
 0x2a4   : > { %v914_v40 = vpop.eup %913  ;;  %923 = vrcp.f32 %v562_v32 }
 0x2a5   : > { %v916_v41 = vpop.eup %915  ;;  %v565_v42 = vadd.f32 1.0, %v914_v40  ;;  %925 = vpow2.f32 %v781_v31 }
 0x2a6   : > { %v564_v44 = vadd.f32 1.0, %v916_v41 }
 0x2a7   : > { %927 = vrcp.f32 %v565_v42 }
 0x2a8   : > { %v918_v45 = vpop.eup %917  ;;  %929 = vpow2.f32 %v782_v43 }
 0x2a9   : > { %v567_v46 = vadd.f32 1.0, %v918_v45  ;;  %931 = vrcp.f32 %v564_v44  ;;  %v920_v47 = vpop.eup %919 }
 0x2aa   : > { %v566_v51 = vadd.f32 1.0, %v920_v47 }
 0x2ab   : > { %933 = vrcp.f32 %v567_v46 }
 0x2ac   : > { %935 = vrcp.f32 %v566_v51 }
 0x2ad   : > { %v922_v48 = vpop.eup %921 }
 0x2ae   : > { %v924_v49 = vpop.eup %923  ;;  %593 = vperm.xlu1 %908, %v922_v48  }
 0x2af   : > { %v926_v50 = vpop.eup %925  ;;  %588 = vperm.xlu0 %907, %v924_v49  }
 0x2b0   : > { %v568_v53 = vadd.f32 1.0, %v926_v50 }
 0x2b1   : > { %v928_v52 = vpop.eup %927 }
 0x2b2   : > { %603 = vperm.xlu1 %908, %v928_v52   ;;  %v930_v54 = vpop.eup %929  ;;  %937 = vrcp.f32 %v568_v53 }
 0x2b3   : > { %v932_v55 = vpop.eup %931  ;;  %v569_v57 = vadd.f32 1.0, %v930_v54 }
 0x2b5   : > { %v934_v56 = vpop.eup %933  ;;  %939 = vrcp.f32 %v569_v57 }
 0x2b6   : > { %598 = vperm.xlu1 %908, %v932_v55   ;;  %v936_v58 = vpop.eup %935 }
 0x2ba   : > { %613 = vperm.xlu1 %908, %v934_v56  }
 0x2bc   : > { %v938_v59 = vpop.eup %937 }
 0x2be   : > { %608 = vperm.xlu1 %908, %v936_v58  }
 0x2bf   : > { %v940_v60 = vpop.eup %939 }
 0x2c2   : > { %618 = vperm.xlu1 %908, %v938_v59  }
 0x2c6   : > { %623 = vperm.xlu1 %908, %v940_v60  }
 0x32d   : > { %v594_v61 = vpop.permute.xlu1 %593 }
 0x32e   : > { %v629_v62 = vmul.f32 %v594_v61, %v1229_v16  ;;  %v630_v63 = vmul.f32 %v594_v61, %v1232_v17  ;;  %v631_v3 = vmul.f32 %v594_v61, %v1235_v18  ;;  %v589_v4 = vpop.permute.xlu0 %588 }
 0x32f   : > { %v626_v8 = vmul.f32 %v589_v4, %v1203_v5  ;;  %v627_v9 = vmul.f32 %v589_v4, %v1206_v6  ;;  %v628_v13 = vmul.f32 %v589_v4, %v1209_v7 }
 0x330   : > { %653 = vst [vmem:[%s1364_s9 + $0x18] sm:$0xff] %v629_v62  ;;  %654 = vst [vmem:[%s1364_s9 + $0x20] sm:$0xff] %v630_v63 }
 0x331   : > { %655 = vst.msk [vmem:[%s1364_s9 + $0x28] sm:$0xff] %vm268_vm0, %v631_v3  ;;  %650 = vst [vmem:[%s1364_s9] sm:$0xff] %v626_v8  ;;  %v604_v5 = vpop.permute.xlu1 %603 }
 0x332   : > { %651 = vst [vmem:[%s1364_s9 + $0x8] sm:$0xff] %v627_v9  ;;  %652 = vst.msk [vmem:[%s1364_s9 + $0x10] sm:$0xff] %vm268_vm0, %v628_v13  ;;  %v635_v6 = vmul.f32 %v604_v5, %v1216_v10  ;;  %v636_v7 = vmul.f32 %v604_v5, %v1219_v11  ;;  %v637_v16 = vmul.f32 %v604_v5, %v1222_v12 }
 0x334   : > { %659 = vst [vmem:[%s1364_s9 + $0x48] sm:$0xff] %v635_v6  ;;  %660 = vst [vmem:[%s1364_s9 + $0x50] sm:$0xff] %v636_v7 }
 0x335   : > { %661 = vst.msk [vmem:[%s1364_s9 + $0x58] sm:$0xff] %vm268_vm0, %v637_v16  ;;  %v599_v17 = vpop.permute.xlu1 %598 }
 0x336   : > { %v632_v18 = vmul.f32 %v599_v17, %v1190_v0  ;;  %v633_v14 = vmul.f32 %v599_v17, %v1193_v1  ;;  %v634_v15 = vmul.f32 %v599_v17, %v1196_v2 }
 0x338   : > { %656 = vst [vmem:[%s1364_s9 + $0x30] sm:$0xff] %v632_v18  ;;  %657 = vst [vmem:[%s1364_s9 + $0x38] sm:$0xff] %v633_v14 }
 0x339   : > { %658 = vst.msk [vmem:[%s1364_s9 + $0x40] sm:$0xff] %vm268_vm0, %v634_v15  ;;  %v614_v10 = vpop.permute.xlu1 %613 }
 0x33a   : > { %v641_v11 = vmul.f32 %v614_v10, %v1242_v22  ;;  %v642_v12 = vmul.f32 %v614_v10, %v1245_v23  ;;  %v643_v19 = vmul.f32 %v614_v10, %v1248_v24 }
 0x33c   : > { %665 = vst [vmem:[%s1364_s9 + $0x78] sm:$0xff] %v641_v11  ;;  %666 = vst [vmem:[%s1364_s9 + $0x80] sm:$0xff] %v642_v12 }
 0x33d   : > { %667 = vst.msk [vmem:[%s1364_s9 + $0x88] sm:$0xff] %vm268_vm0, %v643_v19  ;;  %v609_v0 = vpop.permute.xlu1 %608 }
 0x33e   : > { %v638_v1 = vmul.f32 %v609_v0, %v1253_v27  ;;  %v639_v2 = vmul.f32 %v609_v0, %v1256_v28  ;;  %v640_v20 = vmul.f32 %v609_v0, %v1259_v29 }
 0x340   : > { %662 = vst [vmem:[%s1364_s9 + $0x60] sm:$0xff] %v638_v1  ;;  %663 = vst [vmem:[%s1364_s9 + $0x68] sm:$0xff] %v639_v2 }
 0x341   : > { %664 = vst.msk [vmem:[%s1364_s9 + $0x70] sm:$0xff] %vm268_vm0, %v640_v20  ;;  %v619_v22 = vpop.permute.xlu1 %618 }
 0x342   : > { %v644_v23 = vmul.f32 %v619_v22, %v1277_v37  ;;  %v645_v24 = vmul.f32 %v619_v22, %v1280_v38  ;;  %v646_v27 = vmul.f32 %v619_v22, %v1283_v39 }
 0x344   : > { %668 = vst [vmem:[%s1364_s9 + $0x90] sm:$0xff] %v644_v23  ;;  %669 = vst [vmem:[%s1364_s9 + $0x98] sm:$0xff] %v645_v24 }
 0x345   : > { %670 = vst.msk [vmem:[%s1364_s9 + $0xa0] sm:$0xff] %vm268_vm0, %v646_v27  ;;  %v624_v28 = vpop.permute.xlu1 %623 }
 0x346   : > { %v647_v29 = vmul.f32 %v624_v28, %v1266_v33  ;;  %v648_v37 = vmul.f32 %v624_v28, %v1269_v34  ;;  %v649_v38 = vmul.f32 %v624_v28, %v1274_v36 }
 0x348   : > { %671 = vst [vmem:[%s1364_s9 + $0xa8] sm:$0xff] %v647_v29  ;;  %672 = vst [vmem:[%s1364_s9 + $0xb0] sm:$0xff] %v648_v37 }
 0x349   : > { %673 = vst.msk [vmem:[%s1364_s9 + $0xb8] sm:$0xff] %vm268_vm0, %v649_v38 }
 0x34a   : > { %984 = shalt.err (!%p981_p2)
}
 0x34b   : > { %s985_s14 = scalar_lea.hbm %s1414_s25, 3072  ;;  %s989_s6 = scalar_lea.hbm %s1472_s5, 6144 }
 0x34c   : > { %p986_p4 = scmp.ne.s32.totalorder %s1414_s25, %s985_s14  ;;  %p990_p9 = scmp.lt.u32.totalorder %s1414_s25, %s1472_s5 }
 0x34d   : > { %p991_p1 = scmp.lt.u32.totalorder %s989_s6, %s985_s14  ;;  %p993_p6 = scmp.lt.u32.totalorder %s985_s14, %s1414_s25 }
 0x34e   : > { %p987_p5 = pnand %p986_p4, %p1478_p11 }
 0x34f   : > { %p992_p3 = por %p991_p1, %p990_p9 }
 0x350   : > { %p988_p7 = pneg %p987_p5 }
 0x351   : > { %p994_p12 = por %p993_p6, %p992_p3 }
 0x353   : > { %p995_p13 = pnand %p994_p12, %p988_p7 }
 0x355   : > { %998 = shalt.err (!%p995_p13)
}
 0x356   : > { %s1047_s23 = smov 384   ;;  %s1048_s13 = smov 24  }
 0x357   : > { %855 = dma.vmem_to_hbm [thread:$0]  (%p1478_p11), %s1416_s10, 3072, %s1414_s25, %s675_s22, %s1047_s23, %s1047_s23, %s1048_s13  }
 0x358 PF: > { %s703_s16 = sand.u32 1, %s1025_s18   ;;  %p1479_p8 = scmp.ne.s32.totalorder %s1476_s30, 0 }
 0x359   : > { %p1480_p10 = scmp.ge.s32.totalorder %s1037_s21, 2  ;;  %s704_s26 = scalar_lea.sflag [#allocation4], %s703_s16 }
 0x35b   : > { %p862_p0 = pnand %p1480_p10, %p1479_p8 }
 0x35d   : > { %1020 = dma.done.wait (!%p862_p0), %s704_s26, 3072  }
 0x35e   : > { %1022 = vsyncadd (!%p862_p0), %s704_s26, 4294964224  ;;  %p18_p2 = scmp.ge.s32.totalorder %s1104_s24, 4   ;;  %s1481_s18 = smov %s1029_s19 }
 0x35f   : > { %s1482_s19 = smov %s1033_s20  ;;  %s1483_s20 = smov %s1116_s27 }
 0x360   : > { %s1484_s21 = smov %s1104_s24  ;;  %20 = sbr.rel (!%p18_p2) target bundleno = 5 (0x5), region = 85 }
 0x367   :  { %709 = vsyncpa [#allocation3], 1 }
 0x368   :  { %711 = vsyncpa [#allocation3 + $0x1], 1 }
 0x369   :  { %712 = vsyncpa [#allocation4], 1 }
 0x36a   :  { %714 = vsyncpa [#allocation4 + $0x1], 1 }

</bundles_post_ra>
